<compile_context>
chip_gen: v5e
topology: v5e:2x2
jax: 0.10.0
libtpu: 0.0.40
codegen_flags: <defaults>
</compile_context>

<pallas_src>
import functools

import jax
import jax.numpy as jnp
from jax import lax
from jax.experimental import pallas as pl
from jax.experimental.pallas import tpu as pltpu

_LANE = 128


def _round_up(x, m):
    return -(-x // m) * m


def _heatmap_loss_kernel(
    pred_ref, gt_ref, out_ref, acc_ref, *,
    k_total, bk, chunk, n_full, tail, needs_mask, inv_count,
):
    """pred_ref / gt_ref: (BN, BK) tile of BN flattened samples.

    acc_ref: (BN, chunk) f32 scratch, resident across the K grid axis.
    out_ref: (BN, 128) per-sample-group output block (written in the epilogue).
    """
    bn = pred_ref.shape[0]
    kb = pl.program_id(1)

    # Zero the resident accumulator on the first K step of each sample group.
    @pl.when(kb == 0)
    def _():
        acc_ref[...] = jnp.zeros_like(acc_ref)

    block_base = kb * bk  # first flat-K index (within a sample) of this tile

    def accumulate(start, width, lane_idx):
        p = pred_ref[:, pl.ds(start, width)].astype(jnp.float32)
        g = gt_ref[:, pl.ds(start, width)].astype(jnp.float32)
        d = p - g
        sq = d * d
        if needs_mask:
            # Zero lanes past the true K extent (last K block overhang only).
            sq = jnp.where(lane_idx < (k_total - block_base - start), sq, 0.0)
        acc_ref[:, 0:width] += sq

    if n_full > 0:
        # Hoisted, loop-invariant lane indices (only needed when masking).
        lane_idx = (
            lax.broadcasted_iota(jnp.int32, (bn, chunk), 1) if needs_mask else None
        )

        @pl.loop(0, n_full)
        def _(c):
            accumulate(pl.multiple_of(c * chunk, _LANE), chunk, lane_idx)

    if tail > 0:
        tail_idx = (
            lax.broadcasted_iota(jnp.int32, (bn, tail), 1) if needs_mask else None
        )
        accumulate(n_full * chunk, tail, tail_idx)

    # Epilogue: cross-lane reduce + mean scaling, once per sample group.
    @pl.when(kb == pl.num_programs(1) - 1)
    def _():
        row_sum = jnp.sum(acc_ref[...], axis=1, keepdims=True)      # (BN, 1)
        out_ref[...] = jnp.broadcast_to(
            row_sum * inv_count, out_ref.shape
        ).astype(out_ref.dtype)


def heatmap_loss(
    pred, gt, *,
    tile_bytes_per_input=4 * 1024 * 1024,   # per-input per-step DMA tile
    chunk_bytes=512 * 1024,                 # bound on in-kernel f32 intermediates
):
    """Per-sample mean squared heatmap error, shape (N,), float32."""
    assert pred.shape == gt.shape, "pred and gt must have identical shapes"
    assert pred.dtype == gt.dtype, "pred and gt must have identical dtypes"
    n, c, h, w = pred.shape
    k_total = c * h * w
    itemsize = jnp.dtype(pred.dtype).itemsize

    # --- batch block: samples per grid step (dtype-aware sublane packing) ----
    sub = max(8, 32 // itemsize)             # 8 for f32, 16 for bf16, 32 for int8
    bn = n if n <= 2 * sub else 2 * sub      # == full dim (always legal) or 2 tiles

    # --- K tiling: balanced lane-aligned blocks, no wrapper padding ----------
    k_lanes = _round_up(k_total, _LANE)
    # chunk: in-kernel unit that bounds live f32 intermediates to ~chunk_bytes.
    chunk = min(k_lanes, max(_LANE, (chunk_bytes // (bn * 4)) // _LANE * _LANE))
    # per-step lane budget from the per-input tile-byte budget; keeps the
    # double-buffered working set (2 inputs x 2 bufs) inside 32 MiB VMEM.
    max_bk = max(chunk, (tile_bytes_per_input // (bn * itemsize)) // _LANE * _LANE)
    if k_lanes <= max_bk:
        nkb = 1
        bk = k_total                          # == full array dim: always legal
    else:
        nkb = -(-k_lanes // max_bk)
        bk = _round_up(-(-k_lanes // nkb), _LANE)   # balanced, mult of 128, <= K
    n_full = bk // chunk
    tail = bk - n_full * chunk
    needs_mask = (nkb * bk) != k_total        # last K block overhangs -> mask

    grid_n = -(-n // bn)

    p2 = pred.reshape(n, k_total)             # free reshape, no copy
    g2 = gt.reshape(n, k_total)

    kernel = functools.partial(
        _heatmap_loss_kernel,
        k_total=k_total, bk=bk, chunk=chunk, n_full=n_full, tail=tail,
        needs_mask=needs_mask, inv_count=1.0 / float(k_total),
    )

    out = pl.pallas_call(
        kernel,
        out_shape=jax.ShapeDtypeStruct((n, _LANE), jnp.float32),
        grid_spec=pltpu.PrefetchScalarGridSpec(
            num_scalar_prefetch=0,
            grid=(grid_n, nkb),
            in_specs=[
                pl.BlockSpec((bn, bk), lambda i, k: (i, k)),
                pl.BlockSpec((bn, bk), lambda i, k: (i, k)),
            ],
            # Same output block across the reduction axis -> stays resident;
            # written once per sample group (lane-dense 128-wide store).
            out_specs=pl.BlockSpec((bn, _LANE), lambda i, k: (i, 0)),
            scratch_shapes=[pltpu.VMEM((bn, chunk), jnp.float32)],
        ),
        compiler_params=pltpu.CompilerParams(
            # N blocks are independent -> shard across TensorCores; K is a
            # sequential reduction (innermost).
            dimension_semantics=("parallel", "arbitrary"),
            # Above v5e's 16 MiB scoped default; safe on v7x (64 MiB physical).
            vmem_limit_bytes=32 * 1024 * 1024,
        ),
    )(p2, g2)

    return out[:, 0]


if __name__ == "__main__":
    key = jax.random.PRNGKey(0)
    k1, k2, k3, k4, k5, k6 = jax.random.split(key, 6)

    def reference(pred, gt):
        return jnp.mean(jnp.mean(jnp.mean((pred - gt) ** 2, axis=3), axis=2), axis=1)

    # 1) Small shape implied by the module's forward: (N, C, H, W), K = 1024.
    N, C, H, W = 2, 4, 16, 16
    pred = jax.random.normal(k1, (N, C, H, W), dtype=jnp.float32)
    gt = jax.random.uniform(k2, (N, C, H, W), dtype=jnp.float32)
    loss = jax.block_until_ready(heatmap_loss(pred, gt))
    assert loss.shape == (N,)
    assert jnp.allclose(loss, reference(pred, gt), rtol=1e-5, atol=1e-6)

    # 2) K not a multiple of 128 (single block == full K dim, unaligned tail).
    pred2 = jax.random.normal(k3, (5, 3, 9, 7), dtype=jnp.float32)
    gt2 = jax.random.uniform(k4, (5, 3, 9, 7), dtype=jnp.float32)
    loss2 = jax.block_until_ready(heatmap_loss(pred2, gt2))
    assert jnp.allclose(loss2, reference(pred2, gt2), rtol=1e-5, atol=1e-6)

    # 3) Multi-block K with overhang (exercises the in-kernel mask and the
    #    resident accumulator across K grid steps) by forcing tiny tiles.
    pred3 = jax.random.normal(k5, (3, 4, 23, 23), dtype=jnp.float32)
    gt3 = jax.random.uniform(k6, (3, 4, 23, 23), dtype=jnp.float32)
    loss3 = jax.block_until_ready(
        heatmap_loss(pred3, gt3, tile_bytes_per_input=4096, chunk_bytes=4096)
    )
    assert jnp.allclose(loss3, reference(pred3, gt3), rtol=1e-5, atol=1e-6)

    print("KERNEL_OK")
</pallas_src>

<mosaic_0001>
module attributes {stable_mosaic.version = 11 : i64} {
  func.func @_heatmap_loss_kernel(%arg0: i32, %arg1: i32, %arg2: memref<2x1024xf32, #tpu.memory_space<vmem>>, %arg3: memref<2x1024xf32, #tpu.memory_space<vmem>>, %arg4: memref<2x128xf32, #tpu.memory_space<vmem>>, %arg5: memref<2x1024xf32, #tpu.memory_space<vmem>>) attributes {dimension_semantics = [#tpu.dimension_semantics<parallel>, #tpu.dimension_semantics<arbitrary>], iteration_bounds = array<i64: 1, 1>, scalar_prefetch = 0 : i64, scratch_operands = 1 : i64, tpu.core_type = #tpu.core_type<tc>, window_params = [{transform_indices = @transform_0, window_bounds = array<i64: 2, 1024>}, {transform_indices = @transform_1, window_bounds = array<i64: 2, 1024>}, {transform_indices = @transform_2, window_bounds = array<i64: 2, 128>}]} {
    %c0_i32 = arith.constant 0 : i32
    %0 = arith.cmpi eq, %arg1, %c0_i32 : i32
    %1 = arith.extui %0 : i1 to i32
    %c0_i32_0 = arith.constant 0 : i32
    %2 = arith.cmpi ne, %1, %c0_i32_0 : i32
    scf.if %2 {
      %cst = arith.constant 0.000000e+00 : f32
      %19 = vector.broadcast %cst : f32 to vector<2x1024xf32>
      %c0_11 = arith.constant 0 : index
      %c0_12 = arith.constant 0 : index
      %20 = vector.load %arg5[%c0_11, %c0_12] : memref<2x1024xf32, #tpu.memory_space<vmem>>, vector<2x1024xf32>
      tpu.vector_store %arg5[%c0_11, %c0_12], %19 {strides = array<i32>} : memref<2x1024xf32, #tpu.memory_space<vmem>>, vector<2x1024xf32>,
    } else {
    }
    %c0_i32_1 = arith.constant 0 : i32
    %c1_i32 = arith.constant 1 : i32
    %3 = arith.muli %c0_i32_1, %c1_i32 : i32
    %c0_i32_2 = arith.constant 0 : i32
    %4 = arith.addi %c0_i32_2, %3 : i32
    %c1024_i32 = arith.constant 1024 : i32
    %5 = arith.muli %4, %c1024_i32 : i32
    %6 = tpu.assume_multiple %5, 128 : i32
    %c0 = arith.constant 0 : index
    %7 = arith.index_cast %6 : i32 to index
    %8 = vector.load %arg2[%c0, %7] : memref<2x1024xf32, #tpu.memory_space<vmem>>, vector<2x1024xf32>
    %c0_3 = arith.constant 0 : index
    %9 = arith.index_cast %6 : i32 to index
    %10 = vector.load %arg3[%c0_3, %9] : memref<2x1024xf32, #tpu.memory_space<vmem>>, vector<2x1024xf32>
    %11 = arith.subf %8, %10 : vector<2x1024xf32>
    %12 = arith.mulf %11, %11 : vector<2x1024xf32>
    %c0_4 = arith.constant 0 : index
    %c0_5 = arith.constant 0 : index
    %13 = vector.load %arg5[%c0_4, %c0_5] : memref<2x1024xf32, #tpu.memory_space<vmem>>, vector<2x1024xf32>
    %14 = arith.addf %13, %12 : vector<2x1024xf32>
    %c0_6 = arith.constant 0 : index
    %c0_7 = arith.constant 0 : index
    %15 = vector.load %arg5[%c0_6, %c0_7] : memref<2x1024xf32, #tpu.memory_space<vmem>>, vector<2x1024xf32>
    tpu.vector_store %arg5[%c0_6, %c0_7], %14 {strides = array<i32>} : memref<2x1024xf32, #tpu.memory_space<vmem>>, vector<2x1024xf32>,
    %c1_i32_8 = arith.constant 1 : i32
    %c0_i32_9 = arith.constant 0 : i32
    %16 = arith.cmpi eq, %arg1, %c0_i32_9 : i32
    %17 = arith.extui %16 : i1 to i32
    %c0_i32_10 = arith.constant 0 : i32
    %18 = arith.cmpi ne, %17, %c0_i32_10 : i32
    scf.if %18 {
      %c0_11 = arith.constant 0 : index
      %c0_12 = arith.constant 0 : index
      %19 = vector.load %arg5[%c0_11, %c0_12] : memref<2x1024xf32, #tpu.memory_space<vmem>>, vector<2x1024xf32>
      %cst = arith.constant dense<0.000000e+00> : vector<2xf32>
      %20 = vector.multi_reduction <add>, %19, %cst [1] : vector<2x1024xf32> to vector<2xf32>
      %21 = vector.shape_cast %20 : vector<2xf32> to vector<2x1xf32>
      %cst_13 = arith.constant 9.765625E-4 : f32
      %22 = vector.broadcast %cst_13 : f32 to vector<2x1xf32>
      %23 = arith.mulf %21, %22 : vector<2x1xf32>
      %24 = vector.shape_cast %23 : vector<2x1xf32> to vector<2x1xf32>
      %25 = vector.broadcast %24 : vector<2x1xf32> to vector<2x128xf32>
      %c0_14 = arith.constant 0 : index
      %c0_15 = arith.constant 0 : index
      %26 = vector.load %arg4[%c0_14, %c0_15] : memref<2x128xf32, #tpu.memory_space<vmem>>, vector<2x128xf32>
      tpu.vector_store %arg4[%c0_14, %c0_15], %25 {strides = array<i32>} : memref<2x128xf32, #tpu.memory_space<vmem>>, vector<2x128xf32>,
    } else {
    }
    return
  }
  func.func @transform_0(%arg0: i32, %arg1: i32) -> (i32, i32) {
    %c0_i32 = arith.constant 0 : i32
    return %arg0, %arg1 : i32, i32
  }
  func.func @transform_1(%arg0: i32, %arg1: i32) -> (i32, i32) {
    %c0_i32 = arith.constant 0 : i32
    return %arg0, %arg1 : i32, i32
  }
  func.func @transform_2(%arg0: i32, %arg1: i32) -> (i32, i32) {
    %c0_i32 = arith.constant 0 : i32
    %c0_i32_0 = arith.constant 0 : i32
    return %arg0, %c0_i32 : i32, i32
  }
}

</mosaic_0001>

<bundles_post_ra>
// kernel: tpu_custom_call.1
= control target key start
LH: loop header
LB: loop body
LE: loop exit
PB: predicated region body
PF: predicated region fallthrough
CT: control target
= control target key end

     0   :  { %7 = vsyncpa [#allocation4], 0  ;;  %s240_s0 = inlined_call_operand.hbm [shape: f32[2,1024], index: 0, kind: input, shape index: {}]   ;;  %s241_s1 = inlined_call_operand.hbm [shape: f32[2,1024], index: 1, kind: input, shape index: {}]   ;;  %s242_s2 = inlined_call_operand.hbm [shape: f32[2,128], index: 2, kind: output, shape index: {}]  }
   0x1   :  { %8 = vsyncpa [#allocation7], 0 }
   0x2   :  { %9 = vsyncpa [#allocation5], 0  ;;  %s15_s11 = sshll.u32 %s240_s0, 4  ;;  %s205_s12 = smov [#allocation3]   ;;  %s16_s11 = int_to_ptr.hbm [resolvable:$true] %s15_s11 }
   0x3   :  { %s17_s13 = sshll.u32 %s205_s12, 4  ;;  %s26_s16 = sshll.u32 %s241_s1, 4  ;;  %s18_s13 = int_to_ptr.vmem [resolvable:$true] %s17_s13  ;;  %s27_s16 = int_to_ptr.hbm [resolvable:$true] %s26_s16 }
   0x4   :  { %20 = dma.hbm_to_vmem [thread:$0]  %s16_s11, 256, %s18_s13, [#allocation4]  }
   0x5   :  { %s206_s17 = smov [#allocation6]  }
   0x6   :  { %s28_s18 = sshll.u32 %s206_s17, 4  ;;  %s29_s18 = int_to_ptr.vmem [resolvable:$true] %s28_s18 }
   0x7   :  { %31 = dma.hbm_to_vmem [thread:$0]  %s27_s16, 256, %s29_s18, [#allocation7]  }
   0x8   :  { %199 = dma.done.wait [#allocation4], 256  }
   0x9   :  { %200 = vsyncadd [#allocation4], 4294967040 }
   0xa   :  { %201 = dma.done.wait [#allocation7], 256  }
   0xb   :  { %202 = vsyncadd [#allocation7], 4294967040  ;;  %v46_v0 = vld [vmem:[#allocation3] sm:$0xff]  ;;  %v47_v1 = vld [vmem:[#allocation3 + $0x8] sm:$0xff]  ;;  %vm86_vm0 = vcmask 1041408   ;;  %s207_s0 = smov [#allocation8]  }
   0xc   :  { %v48_v2 = vld [vmem:[#allocation6] sm:$0xff]  ;;  %v49_v3 = vld [vmem:[#allocation6 + $0x8] sm:$0xff]  ;;  %s111_s1 = sshll.u32 %s207_s0, 4  ;;  %s113_s21 = sshll.u32 %s242_s2, 4  ;;  %s112_s1 = int_to_ptr.vmem [resolvable:$true] %s111_s1  ;;  %s114_s21 = int_to_ptr.hbm [resolvable:$true] %s113_s21 }
   0xd   :  { %v50_v4 = vsub.f32 %v46_v0, %v48_v2  ;;  %v51_v5 = vsub.f32 %v47_v1, %v49_v3 }
   0xf   :  { %v52_v6 = vmul.f32 %v50_v4, %v50_v4  ;;  %v53_v7 = vmul.f32 %v51_v5, %v51_v5 }
  0x11   :  { %67 = vst [vmem:[#allocation1] ss:$4 sm:$0xff] %v52_v6 }
  0x12   :  { %69 = vst [vmem:[#allocation1 + $0x20] ss:$4 sm:$0xff] %v53_v7 }
  0x18   :  { %v70_v8 = vld.sshfl [vmem:[#allocation1] sm:$0xff pattern:$0x73625140]  ;;  %v71_v9 = vld.sshfl [vmem:[#allocation1 + $0x8] sm:$0xff pattern:$0x73625140] }
  0x19   :  { %v72_v10 = vld.sshfl [vmem:[#allocation1 + $0x10] sm:$0xff pattern:$0x73625140]  ;;  %v73_v11 = vld.sshfl [vmem:[#allocation1 + $0x18] sm:$0xff pattern:$0x73625140] }
  0x1a   :  { %v87_v12 = vsel %vm86_vm0, %v70_v8, 0.0  ;;  %v88_v13 = vsel %vm86_vm0, %v71_v9, 0.0  ;;  %v90_v14 = vsel %vm86_vm0, %v72_v10, 0.0  ;;  %v74_v15 = vld.sshfl [vmem:[#allocation1 + $0x20] sm:$0xff pattern:$0x73625140] }
  0x1b   :  { %v89_v16 = vadd.f32 %v88_v13, %v87_v12  ;;  %v92_v17 = vsel %vm86_vm0, %v73_v11, 0.0  ;;  %v75_v18 = vld.sshfl [vmem:[#allocation1 + $0x28] sm:$0xff pattern:$0x73625140]  ;;  %v94_v20 = vsel %vm86_vm0, %v74_v15, 0.0 }
  0x1c   :  { %v76_v21 = vld.sshfl [vmem:[#allocation1 + $0x30] sm:$0xff pattern:$0x73625140]  ;;  %v96_v23 = vsel %vm86_vm0, %v75_v18, 0.0 }
  0x1d   :  { %v91_v19 = vadd.f32 %v90_v14, %v89_v16  ;;  %v77_v24 = vld.sshfl [vmem:[#allocation1 + $0x38] sm:$0xff pattern:$0x73625140]  ;;  %v98_v26 = vsel %vm86_vm0, %v76_v21, 0.0 }
  0x1e   :  { %v100_v28 = vsel %vm86_vm0, %v77_v24, 0.0 }
  0x1f   :  { %v93_v22 = vadd.f32 %v92_v17, %v91_v19 }
  0x21   :  { %v95_v25 = vadd.f32 %v94_v20, %v93_v22 }
  0x23   :  { %v97_v27 = vadd.f32 %v96_v23, %v95_v25 }
  0x25   :  { %v99_v29 = vadd.f32 %v98_v26, %v97_v27 }
  0x27   :  { %v101_v30 = vadd.f32 %v100_v28, %v99_v29 }
  0x29   :  { %102 = vadd.xlane.f32.xlu0 %v101_v30 }
  0x9c   :  { %v103_v31 = vpop.xlane.xlu0 %102 }
  0x9d   :  { %v104_v32 = vmul.f32 0.0009765625, %v103_v31 }
  0x9f   :  { %105 = vst [vmem:[#allocation8] sm:$0x3] %v104_v32 }
  0xa0   :  { %116 = dma.vmem_to_hbm [thread:$0]  %s112_s1, 32, %s114_s21, [#allocation5]  }
  0xa1   :  { %203 = dma.done.wait [#allocation5], 32  }
  0xa2   :  { %204 = vsyncadd [#allocation5], 4294967264 }
  0xa3   :  { %121 = vsyncpa [#allocation4], 1 }
  0xa4   :  { %122 = vsyncpa [#allocation7], 1 }
  0xa5   :  { %123 = vsyncpa [#allocation5], 1 }

</bundles_post_ra>
